<compile_context>
chip_gen: v7x
topology: tpu7x:2x2x1
jax: 0.10.0
libtpu: 0.0.40
codegen_flags: <defaults>
</compile_context>

<pallas_src>
import jax
import jax.numpy as jnp
from jax import lax
from jax.experimental import pallas as pl
from jax.experimental.pallas import tpu as pltpu

PAD_IDX = 0
SOS_IDX = 1
EOS_IDX = 2


def _ar_generate_kernel(ewih_ref,    # (V, 3H)  bf16 : E @ W_ih^T   (fused embed+input proj)
                        whh_ref,     # (H, 3H)  bf16 : W_hh^T
                        bih_ref,     # (1, 3H)  f32
                        bhh_ref,     # (1, 3H)  f32
                        wout_ref,    # (H, V)   bf16 : W_out^T / temperature
                        bout_ref,    # (1, V)   f32  : b_out / temperature
                        gumbel_ref,  # (maxlen, bb, V) f32 pre-sampled Gumbel noise
                        ids_ref):    # out: (bb, maxlen) int32
    maxlen, bb, V = gumbel_ref.shape
    H = whh_ref.shape[0]

    # Hoisted loop-invariant values (iotas / biases) -- not re-broadcast per step.
    vocab_iota = lax.broadcasted_iota(jnp.int32, (bb, V), 1)
    time_iota = lax.broadcasted_iota(jnp.int32, (bb, maxlen), 1)
    bih = bih_ref[...]
    bhh = bhh_ref[...]
    bout = bout_ref[...]

    def step(t, carry):
        h, idx, ids_acc = carry                                    # (bb,H) f32, (bb,1) i32, (bb,maxlen) i32

        # ---- embedder(word_idx) @ W_ih^T, fused: one-hot row select of EWih --
        onehot = (vocab_iota == idx).astype(jnp.bfloat16)          # (bb, V)
        gi = jnp.dot(onehot, ewih_ref[...],
                     preferred_element_type=jnp.float32) + bih     # (bb, 3H)

        # ---- nn.GRUCell(word_vec, h) semantics (gate order r|z|n) -----------
        gh = jnp.dot(h.astype(jnp.bfloat16), whh_ref[...],
                     preferred_element_type=jnp.float32) + bhh     # (bb, 3H)
        r = jax.nn.sigmoid(gi[:, 0 * H:1 * H] + gh[:, 0 * H:1 * H])
        z = jax.nn.sigmoid(gi[:, 1 * H:2 * H] + gh[:, 1 * H:2 * H])
        n = jnp.tanh(gi[:, 2 * H:3 * H] + r * gh[:, 2 * H:3 * H])
        h_new = (1.0 - z) * n + z * h                              # (bb, H)

        # ---- output_layer(h_new); temperature already folded into weights ----
        logits = jnp.dot(h_new.astype(jnp.bfloat16), wout_ref[...],
                         preferred_element_type=jnp.float32) + bout  # (bb, V)

        # ---- random_choice_by_logits: Gumbel-max with pre-sampled noise ------
        y = logits + gumbel_ref[t]                                 # (bb, V)
        y_max = jnp.max(y, axis=-1, keepdims=True)
        sampled = jnp.min(jnp.where(y == y_max, vocab_iota, V),
                          axis=-1, keepdims=True).astype(jnp.int32)  # (bb, 1)

        # Accumulate into the (bb, maxlen) register tile (lane-select, no
        # dynamic-indexed store, no relayout).
        ids_acc = jnp.where(time_iota == t, sampled, ids_acc)
        return h_new, sampled, ids_acc

    h0 = jnp.zeros((bb, H), jnp.float32)                    # _get_start_token_and_state
    idx0 = jnp.full((bb, 1), SOS_IDX, jnp.int32)
    ids0 = jnp.zeros((bb, maxlen), jnp.int32)
    _, _, ids = lax.fori_loop(0, maxlen, step, (h0, idx0, ids0))

    ids_ref[...] = ids                                       # single lane-dense writeback


def make_params(key, vocab, embed_dim, hidden):
    ks = jax.random.split(key, 7)
    s = 0.1
    return dict(
        embedding=jax.random.normal(ks[0], (vocab, embed_dim), jnp.float32) * s,
        w_ih=jax.random.normal(ks[1], (3 * hidden, embed_dim), jnp.float32) * s,
        w_hh=jax.random.normal(ks[2], (3 * hidden, hidden), jnp.float32) * s,
        b_ih=jax.random.normal(ks[3], (3 * hidden,), jnp.float32) * s,
        b_hh=jax.random.normal(ks[4], (3 * hidden,), jnp.float32) * s,
        w_out=jax.random.normal(ks[5], (vocab, hidden), jnp.float32) * s,
        b_out=jax.random.normal(ks[6], (vocab,), jnp.float32) * s,
    )


def auto_regressive_generate(params, batch_size, maxlen, *, rng=None, temperature=None):
    """Equivalent of AutoRegressiveGenerator.forward -> ids of shape [B, maxlen] (int32)."""
    if temperature is not None and temperature <= 0:
        raise ValueError(f"temperature must be > 0, got {temperature}")

    emb = params["embedding"]                       # (V, D) f32
    V, D = emb.shape
    H = params["w_hh"].shape[1]

    # Fold embedding into the GRU input projection: one matmul per step instead
    # of embed + x@Wih.  bf16 weights, f32 biases.
    ewih = jnp.dot(emb, params["w_ih"].T).astype(jnp.bfloat16)        # (V, 3H)
    whh_t = params["w_hh"].T.astype(jnp.bfloat16)                     # (H, 3H)
    bih = params["b_ih"][None, :].astype(jnp.float32)                 # (1, 3H)
    bhh = params["b_hh"][None, :].astype(jnp.float32)                 # (1, 3H)

    wout_t = params["w_out"].T                                        # (H, V)
    bout = params["b_out"][None, :]                                   # (1, V)
    if temperature is not None:                                       # fold temperature once
        wout_t = wout_t / temperature
        bout = bout / temperature
    wout_t = wout_t.astype(jnp.bfloat16)
    bout = bout.astype(jnp.float32)

    if rng is None:
        rng = jax.random.PRNGKey(0)
    gumbel = jax.random.gumbel(rng, (maxlen, batch_size, V), dtype=jnp.float32)

    # Batch-block grid axis: split the independent per-row AR chains so the two
    # TensorCores on v7x each take half ("parallel"); single block on v5e/v6e
    # or for small batches.  Block must be a multiple of 8 (sublane rule).
    if batch_size % 16 == 0:
        b_block = batch_size // 2
    else:
        b_block = batch_size
    grid = (batch_size // b_block,)

    full = lambda i: (0, 0)  # weights: fully resident, grid-invariant

    ids = pl.pallas_call(
        _ar_generate_kernel,
        out_shape=jax.ShapeDtypeStruct((batch_size, maxlen), jnp.int32),
        grid=grid,
        in_specs=[
            pl.BlockSpec((V, 3 * H), full),
            pl.BlockSpec((H, 3 * H), full),
            pl.BlockSpec((1, 3 * H), full),
            pl.BlockSpec((1, 3 * H), full),
            pl.BlockSpec((H, V), full),
            pl.BlockSpec((1, V), full),
            pl.BlockSpec((maxlen, b_block, V), lambda i: (0, i, 0)),
        ],
        out_specs=pl.BlockSpec((b_block, maxlen), lambda i: (i, 0)),
        compiler_params=pltpu.CompilerParams(dimension_semantics=("parallel",)),
    )(ewih, whh_t, bih, bhh, wout_t, bout, gumbel)

    return ids                                       # (B, maxlen), like torch.stack(ids_list, dim=1)


if __name__ == "__main__":
    key = jax.random.PRNGKey(0)
    pkey, gkey = jax.random.split(key)

    B, MAXLEN = 8, 8
    VOCAB, EMBED, HIDDEN = 128, 32, 128

    params = make_params(pkey, VOCAB, EMBED, HIDDEN)
    ids = auto_regressive_generate(params, B, MAXLEN, rng=gkey, temperature=None)
    ids = jax.block_until_ready(ids)

    assert ids.shape == (B, MAXLEN), ids.shape
    assert ids.dtype == jnp.int32, ids.dtype
    assert bool(jnp.all((ids >= 0) & (ids < VOCAB)))
    print("KERNEL_OK")
</pallas_src>

<mosaic_0001>
module attributes {stable_mosaic.version = 11 : i64} {
  func.func @_ar_generate_kernel(%arg0: i32, %arg1: memref<128x384xbf16, #tpu.memory_space<vmem>>, %arg2: memref<128x384xbf16, #tpu.memory_space<vmem>>, %arg3: memref<1x384xf32, #tpu.memory_space<vmem>>, %arg4: memref<1x384xf32, #tpu.memory_space<vmem>>, %arg5: memref<128x128xbf16, #tpu.memory_space<vmem>>, %arg6: memref<1x128xf32, #tpu.memory_space<vmem>>, %arg7: memref<8x8x128xf32, #tpu.memory_space<vmem>>, %arg8: memref<8x8xi32, #tpu.memory_space<vmem>>) attributes {dimension_semantics = [#tpu.dimension_semantics<parallel>], iteration_bounds = array<i64: 1>, scalar_prefetch = 0 : i64, scratch_operands = 0 : i64, tpu.core_type = #tpu.core_type<tc>, window_params = [{pipeline_mode = #tpu.pipeline_mode<synchronous>, transform_indices = @transform_0, window_bounds = array<i64: 128, 384>}, {pipeline_mode = #tpu.pipeline_mode<synchronous>, transform_indices = @transform_1, window_bounds = array<i64: 128, 384>}, {pipeline_mode = #tpu.pipeline_mode<synchronous>, transform_indices = @transform_2, window_bounds = array<i64: 1, 384>}, {pipeline_mode = #tpu.pipeline_mode<synchronous>, transform_indices = @transform_3, window_bounds = array<i64: 1, 384>}, {pipeline_mode = #tpu.pipeline_mode<synchronous>, transform_indices = @transform_4, window_bounds = array<i64: 128, 128>}, {pipeline_mode = #tpu.pipeline_mode<synchronous>, transform_indices = @transform_5, window_bounds = array<i64: 1, 128>}, {transform_indices = @transform_6, window_bounds = array<i64: 8, 8, 128>}, {transform_indices = @transform_7, window_bounds = array<i64: 8, 8>}]} {
    %0 = tpu.iota {dimensions = array<i32: 1>} : vector<8x128xi32>
    %1 = tpu.iota {dimensions = array<i32: 1>} : vector<8x8xi32>
    %c0 = arith.constant 0 : index
    %c0_0 = arith.constant 0 : index
    %2 = vector.load %arg3[%c0, %c0_0] : memref<1x384xf32, #tpu.memory_space<vmem>>, vector<1x384xf32>
    %c0_1 = arith.constant 0 : index
    %c0_2 = arith.constant 0 : index
    %3 = vector.load %arg4[%c0_1, %c0_2] : memref<1x384xf32, #tpu.memory_space<vmem>>, vector<1x384xf32>
    %c0_3 = arith.constant 0 : index
    %c0_4 = arith.constant 0 : index
    %4 = vector.load %arg6[%c0_3, %c0_4] : memref<1x128xf32, #tpu.memory_space<vmem>>, vector<1x128xf32>
    %cst = arith.constant 0.000000e+00 : f32
    %5 = vector.broadcast %cst : f32 to vector<8x128xf32>
    %c1_i32 = arith.constant 1 : i32
    %6 = vector.broadcast %c1_i32 : i32 to vector<8x1xi32>
    %c0_i32 = arith.constant 0 : i32
    %7 = vector.broadcast %c0_i32 : i32 to vector<8x8xi32>
    %c0_i32_5 = arith.constant 0 : i32
    %c8_i32 = arith.constant 8 : i32
    %8 = arith.addi %c0_i32_5, %c8_i32 : i32
    %c1_i32_6 = arith.constant 1 : i32
    %9:3 = scf.for %arg9 = %c0_i32_5 to %8 step %c1_i32_6 iter_args(%arg10 = %5, %arg11 = %6, %arg12 = %7) -> (vector<8x128xf32>, vector<8x1xi32>, vector<8x8xi32>)  : i32 {
      %11 = vector.broadcast %arg11 : vector<8x1xi32> to vector<8x128xi32>
      %12 = arith.cmpi eq, %0, %11 : vector<8x128xi32>
      %13 = arith.extui %12 : vector<8x128xi1> to vector<8x128xi32>
      %14 = arith.sitofp %13 : vector<8x128xi32> to vector<8x128xf32>
      %15 = arith.truncf %14 : vector<8x128xf32> to vector<8x128xbf16>
      %c0_10 = arith.constant 0 : index
      %c0_11 = arith.constant 0 : index
      %16 = vector.load %arg1[%c0_10, %c0_11] : memref<128x384xbf16, #tpu.memory_space<vmem>>, vector<128x384xbf16>
      %cst_12 = arith.constant dense<0.000000e+00> : vector<8x384xf32>
      %17 = tpu.matmul %15, %16, %cst_12 {dimension_numbers = #tpu.dot_dimension_numbers<[1], [0], [0], [1], [0, 0, 1, 1], [], []>} : vector<8x128xbf16>, vector<128x384xbf16>, vector<8x384xf32> -> vector<8x384xf32>
      %18 = vector.broadcast %2 : vector<1x384xf32> to vector<8x384xf32>
      %19 = arith.addf %17, %18 : vector<8x384xf32>
      %20 = arith.truncf %arg10 : vector<8x128xf32> to vector<8x128xbf16>
      %c0_13 = arith.constant 0 : index
      %c0_14 = arith.constant 0 : index
      %21 = vector.load %arg2[%c0_13, %c0_14] : memref<128x384xbf16, #tpu.memory_space<vmem>>, vector<128x384xbf16>
      %cst_15 = arith.constant dense<0.000000e+00> : vector<8x384xf32>
      %22 = tpu.matmul %20, %21, %cst_15 {dimension_numbers = #tpu.dot_dimension_numbers<[1], [0], [0], [1], [0, 0, 1, 1], [], []>} : vector<8x128xbf16>, vector<128x384xbf16>, vector<8x384xf32> -> vector<8x384xf32>
      %23 = vector.broadcast %3 : vector<1x384xf32> to vector<8x384xf32>
      %24 = arith.addf %22, %23 : vector<8x384xf32>
      %25 = vector.extract_strided_slice %19 {offsets = [0, 0], sizes = [8, 128], strides = [1, 1]} : vector<8x384xf32> to vector<8x128xf32>
      %26 = vector.extract_strided_slice %24 {offsets = [0, 0], sizes = [8, 128], strides = [1, 1]} : vector<8x384xf32> to vector<8x128xf32>
      %27 = arith.addf %25, %26 : vector<8x128xf32>
      %28 = arith.negf %27 : vector<8x128xf32>
      %29 = math.exp %28 : vector<8x128xf32>
      %cst_16 = arith.constant 1.000000e+00 : f32
      %30 = vector.broadcast %cst_16 : f32 to vector<8x128xf32>
      %31 = arith.addf %30, %29 : vector<8x128xf32>
      %32 = arith.divf %30, %31 : vector<8x128xf32>
      %33 = vector.extract_strided_slice %19 {offsets = [0, 128], sizes = [8, 128], strides = [1, 1]} : vector<8x384xf32> to vector<8x128xf32>
      %34 = vector.extract_strided_slice %24 {offsets = [0, 128], sizes = [8, 128], strides = [1, 1]} : vector<8x384xf32> to vector<8x128xf32>
      %35 = arith.addf %33, %34 : vector<8x128xf32>
      %36 = arith.negf %35 : vector<8x128xf32>
      %37 = math.exp %36 : vector<8x128xf32>
      %cst_17 = arith.constant 1.000000e+00 : f32
      %38 = vector.broadcast %cst_17 : f32 to vector<8x128xf32>
      %39 = arith.addf %38, %37 : vector<8x128xf32>
      %40 = arith.divf %38, %39 : vector<8x128xf32>
      %41 = vector.extract_strided_slice %19 {offsets = [0, 256], sizes = [8, 128], strides = [1, 1]} : vector<8x384xf32> to vector<8x128xf32>
      %42 = vector.extract_strided_slice %24 {offsets = [0, 256], sizes = [8, 128], strides = [1, 1]} : vector<8x384xf32> to vector<8x128xf32>
      %43 = arith.mulf %32, %42 : vector<8x128xf32>
      %44 = arith.addf %41, %43 : vector<8x128xf32>
      %45 = math.tanh %44 : vector<8x128xf32>
      %cst_18 = arith.constant 1.000000e+00 : f32
      %46 = vector.broadcast %cst_18 : f32 to vector<8x128xf32>
      %47 = arith.subf %46, %40 : vector<8x128xf32>
      %48 = arith.mulf %47, %45 : vector<8x128xf32>
      %49 = arith.mulf %40, %arg10 : vector<8x128xf32>
      %50 = arith.addf %48, %49 : vector<8x128xf32>
      %51 = arith.truncf %50 : vector<8x128xf32> to vector<8x128xbf16>
      %c0_19 = arith.constant 0 : index
      %c0_20 = arith.constant 0 : index
      %52 = vector.load %arg5[%c0_19, %c0_20] : memref<128x128xbf16, #tpu.memory_space<vmem>>, vector<128x128xbf16>
      %cst_21 = arith.constant dense<0.000000e+00> : vector<8x128xf32>
      %53 = tpu.matmul %51, %52, %cst_21 {dimension_numbers = #tpu.dot_dimension_numbers<[1], [0], [0], [1], [0, 0, 1, 1], [], []>} : vector<8x128xbf16>, vector<128x128xbf16>, vector<8x128xf32> -> vector<8x128xf32>
      %54 = vector.broadcast %4 : vector<1x128xf32> to vector<8x128xf32>
      %55 = arith.addf %53, %54 : vector<8x128xf32>
      %56 = arith.index_cast %arg9 : i32 to index
      %c0_22 = arith.constant 0 : index
      %c0_23 = arith.constant 0 : index
      %57 = vector.load %arg7[%56, %c0_22, %c0_23] : memref<8x8x128xf32, #tpu.memory_space<vmem>>, vector<1x8x128xf32>
      %58 = vector.shape_cast %57 : vector<1x8x128xf32> to vector<8x128xf32>
      %59 = arith.addf %55, %58 : vector<8x128xf32>
      %cst_24 = arith.constant dense<0xFF800000> : vector<8xf32>
      %60 = vector.multi_reduction <maximumf>, %59, %cst_24 [1] : vector<8x128xf32> to vector<8xf32>
      %61 = vector.shape_cast %60 : vector<8xf32> to vector<8x1xf32>
      %62 = vector.broadcast %61 : vector<8x1xf32> to vector<8x128xf32>
      %63 = arith.cmpf oeq, %59, %62 : vector<8x128xf32>
      %c128_i32 = arith.constant 128 : i32
      %64 = vector.broadcast %c128_i32 : i32 to vector<8x128xi32>
      %65 = arith.select %63, %0, %64 : vector<8x128xi1>, vector<8x128xi32>
      %cst_25 = arith.constant dense<2147483647> : vector<8xi32>
      %66 = vector.multi_reduction <minsi>, %65, %cst_25 [1] : vector<8x128xi32> to vector<8xi32>
      %67 = vector.shape_cast %66 : vector<8xi32> to vector<8x1xi32>
      %68 = vector.broadcast %arg9 : i32 to vector<8x8xi32>
      %69 = arith.cmpi eq, %1, %68 : vector<8x8xi32>
      %70 = vector.shape_cast %67 : vector<8x1xi32> to vector<8x1xi32>
      %71 = vector.broadcast %70 : vector<8x1xi32> to vector<8x8xi32>
      %72 = arith.select %69, %71, %arg12 : vector<8x8xi1>, vector<8x8xi32>
      scf.yield %50, %67, %72 : vector<8x128xf32>, vector<8x1xi32>, vector<8x8xi32>
    }
    %c8_i32_7 = arith.constant 8 : i32
    %c0_8 = arith.constant 0 : index
    %c0_9 = arith.constant 0 : index
    %10 = vector.load %arg8[%c0_8, %c0_9] : memref<8x8xi32, #tpu.memory_space<vmem>>, vector<8x8xi32>
    tpu.vector_store %arg8[%c0_8, %c0_9], %9#2 {strides = array<i32>} : memref<8x8xi32, #tpu.memory_space<vmem>>, vector<8x8xi32>,
    return
  }
  func.func @transform_0(%arg0: i32) -> (i32, i32) {
    %c0_i32 = arith.constant 0 : i32
    %c0_i32_0 = arith.constant 0 : i32
    %c0_i32_1 = arith.constant 0 : i32
    return %c0_i32, %c0_i32_0 : i32, i32
  }
  func.func @transform_1(%arg0: i32) -> (i32, i32) {
    %c0_i32 = arith.constant 0 : i32
    %c0_i32_0 = arith.constant 0 : i32
    %c0_i32_1 = arith.constant 0 : i32
    return %c0_i32, %c0_i32_0 : i32, i32
  }
  func.func @transform_2(%arg0: i32) -> (i32, i32) {
    %c0_i32 = arith.constant 0 : i32
    %c0_i32_0 = arith.constant 0 : i32
    %c0_i32_1 = arith.constant 0 : i32
    return %c0_i32, %c0_i32_0 : i32, i32
  }
  func.func @transform_3(%arg0: i32) -> (i32, i32) {
    %c0_i32 = arith.constant 0 : i32
    %c0_i32_0 = arith.constant 0 : i32
    %c0_i32_1 = arith.constant 0 : i32
    return %c0_i32, %c0_i32_0 : i32, i32
  }
  func.func @transform_4(%arg0: i32) -> (i32, i32) {
    %c0_i32 = arith.constant 0 : i32
    %c0_i32_0 = arith.constant 0 : i32
    %c0_i32_1 = arith.constant 0 : i32
    return %c0_i32, %c0_i32_0 : i32, i32
  }
  func.func @transform_5(%arg0: i32) -> (i32, i32) {
    %c0_i32 = arith.constant 0 : i32
    %c0_i32_0 = arith.constant 0 : i32
    %c0_i32_1 = arith.constant 0 : i32
    return %c0_i32, %c0_i32_0 : i32, i32
  }
  func.func @transform_6(%arg0: i32) -> (i32, i32, i32) {
    %c0_i32 = arith.constant 0 : i32
    %c0_i32_0 = arith.constant 0 : i32
    %c0_i32_1 = arith.constant 0 : i32
    return %c0_i32, %arg0, %c0_i32_0 : i32, i32, i32
  }
  func.func @transform_7(%arg0: i32) -> (i32, i32) {
    %c0_i32 = arith.constant 0 : i32
    %c0_i32_0 = arith.constant 0 : i32
    return %arg0, %c0_i32 : i32, i32
  }
}

</mosaic_0001>

<bundles_post_ra>
// kernel: tpu_custom_call.1
= control target key start
LH: loop header
LB: loop body
LE: loop exit
PB: predicated region body
PF: predicated region fallthrough
CT: control target
= control target key end

     0   :  { %12 = vsyncpa [#allocation3], 0  ;;  %s1471_s0 = inlined_call_operand.hbm [shape: bf16[128,384], index: 0, kind: input, shape index: {}]   ;;  %s1472_s1 = inlined_call_operand.hbm [shape: bf16[128,384], index: 1, kind: input, shape index: {}]   ;;  %s1473_s2 = inlined_call_operand.vmem [shape: f32[1,384], index: 2, kind: input, shape index: {}]   ;;  %s1474_s3 = inlined_call_operand.vmem [shape: f32[1,384], index: 3, kind: input, shape index: {}]   ;;  %s1475_s4 = inlined_call_operand.hbm [shape: bf16[128,128], index: 4, kind: input, shape index: {}]   ;;  %s1476_s5 = inlined_call_operand.vmem [shape: f32[1,128], index: 5, kind: input, shape index: {}]   ;;  %s1477_s6 = inlined_call_operand.hbm [shape: f32[8,8,128], index: 6, kind: input, shape index: {}]   ;;  %s1478_s7 = inlined_call_operand.hbm [shape: s32[8,8], index: 7, kind: output, shape index: {}]  }
   0x1   :  { %13 = vsyncpa [#allocation6], 0 }
   0x2   :  { %14 = vsyncpa [#allocation9], 0 }
   0x3   :  { %15 = vsyncpa [#allocation4], 0  ;;  %s1247_s24 = smov [#allocation5]   ;;  %s1248_s26 = smov [#allocation2]  }
   0x4   :  { %s33_s25 = sshll.u32 %s1247_s24, 4  ;;  %s21_s27 = sshll.u32 %s1248_s26, 4  ;;  %s34_s25 = int_to_ptr.vmem [resolvable:$true] %s33_s25  ;;  %s1302_s27 = int_to_ptr.vmem [resolvable:$true] %s21_s27 }
   0x5   :  { %s1097_s30 = scalar_lea.hbm %s1472_s1, 3072 }
   0x6   :  { %p1098_p0 = scmp.ne.s32.totalorder %s1472_s1, %s1097_s30  ;;  %p1101_p1 = scmp.lt.u32.totalorder %s1097_s30, %s1472_s1 }
   0x8   :  { %p1103_p2 = pnand %p1101_p1, %p1098_p0 }
   0xa   :  { %1106 = shalt.err (!%p1103_p2)
}
   0xb   :  { %s1107_s12 = scalar_lea.vmem %s34_s25, 3072  ;;  %p1112_p4 = scmp.lt.s32.totalorder %s34_s25, %s34_s25 }
   0xc   :  { %p1108_p3 = scmp.ne.s32.totalorder %s34_s25, %s1107_s12  ;;  %p1113_p5 = scmp.lt.s32.totalorder %s1107_s12, %s1107_s12 }
   0xe   :  { %p1114_p6 = por %p1113_p5, %p1112_p4 }
  0x10   :  { %p1115_p7 = pnand %p1114_p6, %p1108_p3 }
  0x12   :  { %1118 = shalt.err (!%p1115_p7)
}
  0x13   :  { %s1249_s13 = smov 192   ;;  %s1250_s14 = smov 12  }
  0x14   :  { %39 = dma.hbm_to_vmem [thread:$0]  %s1472_s1, 3072, %s34_s25, [#allocation6], %s1249_s13, %s1249_s13, %s1250_s14  }
  0x15   :  { %s1119_s19 = scalar_lea.hbm %s1471_s0, 3072 }
  0x16   :  { %p1120_p8 = scmp.ne.s32.totalorder %s1471_s0, %s1119_s19  ;;  %p1123_p9 = scmp.lt.u32.totalorder %s1119_s19, %s1471_s0 }
  0x18   :  { %p1125_p10 = pnand %p1123_p9, %p1120_p8 }
  0x1a   :  { %1128 = shalt.err (!%p1125_p10)
}
  0x1b   :  { %s1129_s24 = scalar_lea.vmem %s1302_s27, 3072  ;;  %p1134_p12 = scmp.lt.s32.totalorder %s1302_s27, %s1302_s27 }
  0x1c   :  { %p1130_p11 = scmp.ne.s32.totalorder %s1302_s27, %s1129_s24  ;;  %p1135_p13 = scmp.lt.s32.totalorder %s1129_s24, %s1129_s24 }
  0x1e   :  { %p1136_p0 = por %p1135_p13, %p1134_p12 }
  0x20   :  { %p1137_p1 = pnand %p1136_p0, %p1130_p11 }
  0x22   :  { %1140 = shalt.err (!%p1137_p1)
}
  0x23   :  { %27 = dma.hbm_to_vmem [thread:$0]  %s1471_s0, 3072, %s1302_s27, [#allocation3], %s1249_s13, %s1249_s13, %s1250_s14  }
  0x24   :  { %s1251_s26 = smov [#allocation7]   ;;  %s1141_s8 = scalar_lea.hbm %s1475_s4, 1024 }
  0x25   :  { %s49_s28 = sshll.u32 %s1251_s26, 4  ;;  %p1142_p2 = scmp.ne.s32.totalorder %s1475_s4, %s1141_s8  ;;  %s50_s28 = int_to_ptr.vmem [resolvable:$true] %s49_s28 }
  0x26   :  { %p1145_p3 = scmp.lt.u32.totalorder %s1141_s8, %s1475_s4 }
  0x28   :  { %p1147_p4 = pnand %p1145_p3, %p1142_p2 }
  0x2a   :  { %1150 = shalt.err (!%p1147_p4)
}
  0x2b   :  { %s1151_s15 = scalar_lea.vmem %s50_s28, 1024  ;;  %p1156_p6 = scmp.lt.s32.totalorder %s50_s28, %s50_s28 }
  0x2c   :  { %p1152_p5 = scmp.ne.s32.totalorder %s50_s28, %s1151_s15  ;;  %p1157_p7 = scmp.lt.s32.totalorder %s1151_s15, %s1151_s15 }
  0x2e   :  { %p1158_p8 = por %p1157_p7, %p1156_p6 }
  0x30   :  { %p1159_p9 = pnand %p1158_p8, %p1152_p5 }
  0x32   :  { %1162 = shalt.err (!%p1159_p9)
}
  0x33   :  { %s1252_s0 = smov 64   ;;  %s1253_s27 = smov 4  }
  0x34   :  { %55 = dma.hbm_to_vmem [thread:$0]  %s1475_s4, 1024, %s50_s28, [#allocation6], %s1252_s0, %s1252_s0, %s1253_s27  }
  0x35   :  { %s1254_s16 = smov [#allocation8]   ;;  %s1163_s20 = scalar_lea.hbm %s1477_s6, 1024 }
  0x36   :  { %s63_s17 = sshll.u32 %s1254_s16, 4  ;;  %p1164_p10 = scmp.ne.s32.totalorder %s1477_s6, %s1163_s20  ;;  %s64_s17 = int_to_ptr.vmem [resolvable:$true] %s63_s17 }
  0x37   :  { %p1167_p11 = scmp.lt.u32.totalorder %s1163_s20, %s1477_s6 }
  0x39   :  { %p1169_p12 = pnand %p1167_p11, %p1164_p10 }
  0x3b   :  { %1172 = shalt.err (!%p1169_p12)
}
  0x3c   :  { %s1173_s1 = scalar_lea.vmem %s64_s17, 1024  ;;  %p1178_p0 = scmp.lt.s32.totalorder %s64_s17, %s64_s17 }
  0x3d   :  { %p1174_p13 = scmp.ne.s32.totalorder %s64_s17, %s1173_s1  ;;  %p1179_p1 = scmp.lt.s32.totalorder %s1173_s1, %s1173_s1 }
  0x3f   :  { %p1180_p2 = por %p1179_p1, %p1178_p0 }
  0x41   :  { %p1181_p3 = pnand %p1180_p2, %p1174_p13 }
  0x43   :  { %1184 = shalt.err (!%p1181_p3)
}
  0x44   :  { %s1255_s4 = smov 128   ;;  %s1256_s25 = smov 8  }
  0x45   :  { %69 = dma.hbm_to_vmem [thread:$0]  %s1477_s6, 1024, %s64_s17, [#allocation9], %s1255_s4, %s1255_s4, %s1256_s25  }
  0x46   :  { %1223 = dma.done.wait [#allocation3], 3072  }
  0x47   :  { %1224 = vsyncadd [#allocation3], 4294964224 }
  0x48   :  { %1225 = dma.done.wait [#allocation6], 4096  }
  0x49   :  { %1226 = vsyncadd [#allocation6], 4294963200 }
  0x4a   :  { %1227 = dma.done.wait [#allocation9], 1024  }
  0x4b   :  { %1228 = vsyncadd [#allocation9], 4294966272  ;;  %v83_v0 = vlaneseq  ;;  %v1363_v2 = vld [vmem:[%s1473_s2] sm:$0x7]  ;;  %v1375_v5 = vmov 0   ;;  %v1377_v6 = vmov 1  }
  0x4c   :  { %v1368_v3 = vld [vmem:[%s1474_s3] sm:$0x7]  ;;  %v1379_v7 = vmov 0.0   ;;  %s1381_s11 = smov 0  }
  0x4d   :  { %v1358_v1 = vand.u32 127, %v83_v0  ;;  %v1373_v4 = vld [vmem:[%s1476_s5] ss:$0 sm:$0xff] }
  0x4e LB: > { %v1015_v8 = vld [vmem:[#allocation2 + $0x4] ss:$12 sps:$4 sm:$0xff]   ;;  %v1017_v9 = vld [vmem:[#allocation2] ss:$12 sps:$4 sm:$0xff]   ;;  %v1257_v10 = vmov 0.0   ;;  %v1258_v11 = vmov 0   ;;  %v358_v58 = vpack.c.bf16 %v1241_v7, %v1241_v7  ;;  %s1245_s11 = sphi %s1381_s11, %s93_s11   ;;  %v1241_v7 = vphi %v1379_v7, %v636_v7   ;;  %v1237_v6 = vphi %v1377_v6, %v769_v6   ;;  %v1233_v5 = vphi %v1375_v5, %v1481_v5  }
  0x4f   : > { %900 = vmatprep.subr.bf16.mxu1 %v1257_v10  ;;  %309 = vmatprep.mubr.bf16.mxu0 %v1258_v11  ;;  %v1018_v12 = vld [vmem:[#allocation2 + $0x1c] ss:$12 sps:$4 sm:$0xff]   ;;  %v1020_v13 = vld [vmem:[#allocation2 + $0x18] ss:$12 sps:$4 sm:$0xff]   ;;  %vm1259_vm0 = vmmov 0   ;;  %vm97_vm1 = vcmp.eq.s32.totalorder %v1358_v1, %v1237_v6  ;;  %v1081_v63 = vld [vmem:[#allocation7 + $0x10] sm:$0xff]  }
  0x50   : > { %277 = vmatprep.subr.bf16.mxu0 %v1015_v8  ;;  %916 = vmatprep.mubr.msk.bf16.mxu1 %vm1259_vm0, %v1257_v10  ;;  %v1021_v14 = vld [vmem:[#allocation2 + $0x34] ss:$12 sps:$4 sm:$0xff]   ;;  %v1023_v15 = vld [vmem:[#allocation2 + $0x30] ss:$12 sps:$4 sm:$0xff]   ;;  %v1024_v16 = vld [vmem:[#allocation2 + $0x4c] ss:$12 sps:$4 sm:$0xff]  }
  0x51   : > { %278 = vmatpush1.bf16.msra.mxu0 %v1017_v9  ;;  %v1035_v17 = vld [vmem:[#allocation2 + $0x8] ss:$12 sps:$4 sm:$0xff]   ;;  %v1027_v19 = vld [vmem:[#allocation2 + $0x64] ss:$12 sps:$4 sm:$0xff]   ;;  %v1039_v20 = vld [vmem:[#allocation2 + $0x20] ss:$12 sps:$4 sm:$0xff]  }
  0x52   : > { %279 = vmatprep.subr.bf16.mxu0 %v1018_v12  ;;  %v1026_v18 = vld [vmem:[#allocation2 + $0x48] ss:$12 sps:$4 sm:$0xff]   ;;  %901 = vmatpush3.bf16.msra.mxu1 %v1035_v17  ;;  %v1029_v21 = vld [vmem:[#allocation2 + $0x60] ss:$12 sps:$4 sm:$0xff]   ;;  %v1041_v22 = vld [vmem:[#allocation2 + $0x38] ss:$12 sps:$4 sm:$0xff]  }
  0x53   : > { %902 = vmatprep.subr.bf16.mxu1 %v1257_v10  ;;  %v1030_v23 = vld [vmem:[#allocation2 + $0x7c] ss:$12 sps:$4 sm:$0xff]   ;;  %v1032_v24 = vld [vmem:[#allocation2 + $0x78] ss:$12 sps:$4 sm:$0xff]   ;;  %v1033_v26 = vld [vmem:[#allocation2 + $0x94] ss:$12 sps:$4 sm:$0xff]  }
  0x54   : > { %v1045_v25 = vld [vmem:[#allocation2 + $0x50] ss:$12 sps:$4 sm:$0xff]   ;;  %v1049_v28 = vld [vmem:[#allocation2 + $0x68] ss:$12 sps:$4 sm:$0xff]   ;;  %v1037_v29 = vld [vmem:[#allocation2 + $0xac] ss:$12 sps:$4 sm:$0xff]  }
  0x55   : > { %280 = vmatpush1.bf16.msra.mxu0 %v1020_v13  ;;  %v1036_v27 = vld [vmem:[#allocation2 + $0x90] ss:$12 sps:$4 sm:$0xff]   ;;  %v1040_v30 = vld [vmem:[#allocation2 + $0xa8] ss:$12 sps:$4 sm:$0xff]   ;;  %v1053_v31 = vld [vmem:[#allocation2 + $0x80] ss:$12 sps:$4 sm:$0xff]  }
  0x56   : > { %281 = vmatprep.subr.bf16.mxu0 %v1021_v14  ;;  %903 = vmatpush3.bf16.msra.mxu1 %v1039_v20  ;;  %v1044_v32 = vld [vmem:[#allocation5 + $0x4] ss:$12 sps:$4 sm:$0xff]   ;;  %v1042_v33 = vld [vmem:[#allocation5] ss:$12 sps:$4 sm:$0xff]   ;;  %vm1403_vm2 = vmpackc.low %vm97_vm1, %vm97_vm1  ;;  %v1260_v37 = vmov 1.0|1.0  }
  0x57   : > { %904 = vmatprep.subr.bf16.mxu1 %v1257_v10  ;;  %v1057_v35 = vld [vmem:[#allocation2 + $0x98] ss:$12 sps:$4 sm:$0xff]   ;;  %v1048_v36 = vld [vmem:[#allocation5 + $0x1c] ss:$12 sps:$4 sm:$0xff]   ;;  %v1052_v40 = vld [vmem:[#allocation5 + $0x34] ss:$12 sps:$4 sm:$0xff]  }
  0x58   : > { %v1046_v38 = vld [vmem:[#allocation5 + $0x18] ss:$12 sps:$4 sm:$0xff]   ;;  %v1061_v39 = vld [vmem:[#allocation2 + $0xb0] ss:$12 sps:$4 sm:$0xff]   ;;  %v1068_v42 = vld [vmem:[#allocation5 + $0x8] ss:$12 sps:$4 sm:$0xff]  }
  0x59   : > { %282 = vmatpush1.bf16.msra.mxu0 %v1023_v15  ;;  %v1050_v41 = vld [vmem:[#allocation5 + $0x30] ss:$12 sps:$4 sm:$0xff]   ;;  %v1056_v43 = vld [vmem:[#allocation5 + $0x4c] ss:$12 sps:$4 sm:$0xff]   ;;  %v1054_v44 = vld [vmem:[#allocation5 + $0x48] ss:$12 sps:$4 sm:$0xff]  }
  0x5a   : > { %283 = vmatprep.subr.bf16.mxu0 %v1024_v16  ;;  %905 = vmatpush3.bf16.msra.mxu1 %v1041_v22  ;;  %v1072_v45 = vld [vmem:[#allocation5 + $0x20] ss:$12 sps:$4 sm:$0xff]   ;;  %v1060_v46 = vld [vmem:[#allocation5 + $0x64] ss:$12 sps:$4 sm:$0xff]   ;;  %v1064_v49 = vld [vmem:[#allocation5 + $0x7c] ss:$12 sps:$4 sm:$0xff]  }
  0x5b   : > { %906 = vmatprep.subr.bf16.mxu1 %v1257_v10  ;;  %v1058_v47 = vld [vmem:[#allocation5 + $0x60] ss:$12 sps:$4 sm:$0xff]   ;;  %v1073_v48 = vld [vmem:[#allocation5 + $0x38] ss:$12 sps:$4 sm:$0xff]   ;;  %v1074_v51 = vld [vmem:[#allocation5 + $0x50] ss:$12 sps:$4 sm:$0xff]  }
  0x5c   : > { %v1062_v50 = vld [vmem:[#allocation5 + $0x78] ss:$12 sps:$4 sm:$0xff]   ;;  %v1067_v52 = vld [vmem:[#allocation5 + $0x94] ss:$12 sps:$4 sm:$0xff]   ;;  %v1065_v53 = vld [vmem:[#allocation5 + $0x90] ss:$12 sps:$4 sm:$0xff]  }
  0x5d   : > { %284 = vmatpush1.bf16.msra.mxu0 %v1026_v18  ;;  %v1075_v54 = vld [vmem:[#allocation5 + $0x68] ss:$12 sps:$4 sm:$0xff]   ;;  %v1071_v55 = vld [vmem:[#allocation5 + $0xac] ss:$12 sps:$4 sm:$0xff]   ;;  %v1078_v60 = vld [vmem:[#allocation5 + $0xb0] ss:$12 sps:$4 sm:$0xff]  }
  0x5e   : > { %285 = vmatprep.subr.bf16.mxu0 %v1027_v19  ;;  %907 = vmatpush3.bf16.msra.mxu1 %v1045_v25  ;;  %v1069_v56 = vld [vmem:[#allocation5 + $0xa8] ss:$12 sps:$4 sm:$0xff]   ;;  %v1076_v57 = vld [vmem:[#allocation5 + $0x80] ss:$12 sps:$4 sm:$0xff]   ;;  %v1077_v59 = vld [vmem:[#allocation5 + $0x98] ss:$12 sps:$4 sm:$0xff]  }
  0x5f   : > { %908 = vmatprep.subr.bf16.mxu1 %v1257_v10  ;;  %v1079_v61 = vld [vmem:[#allocation7] sm:$0xff]   ;;  %v1080_v62 = vld [vmem:[#allocation7 + $0x8] sm:$0xff]   ;;  %v1082_v6 = vld [vmem:[#allocation7 + $0x18] sm:$0xff]   ;;  %v135_v17 = vshrl.u32 %v83_v0, 7  ;;  %s872_s2 = sshll.u32 %s1245_s11, 3 }
  0x60   : > { %v1083_v8 = vld [vmem:[#allocation7 + $0x20] sm:$0xff]   ;;  %v1084_v9 = vld [vmem:[#allocation7 + $0x28] sm:$0xff]   ;;  %v1086_v12 = vld [vmem:[#allocation7 + $0x38] sm:$0xff]   ;;  %s749_s3 = scalar_lea.vmem [#allocation8], %s872_s2 }
  0x61   : > { %286 = vmatpush1.bf16.msra.mxu0 %v1029_v21  ;;  %v136_v18 = vsub.s32 0, %v135_v17  ;;  %v140_v19 = vsub.s32 1, %v135_v17 }
  0x62   : > { %287 = vmatprep.subr.bf16.mxu0 %v1030_v23  ;;  %909 = vmatpush3.bf16.msra.mxu1 %v1049_v28 }
  0x63   : > { %910 = vmatprep.subr.bf16.mxu1 %v1257_v10  ;;  %v137_v20 = vrot.slane %v1363_v2, %v136_v18  ;;  %v395_v21 = vrot.slane %v1368_v3, %v136_v18  ;;  %v141_v22 = vrot.slane %v1363_v2, %v140_v19  ;;  %v399_v23 = vrot.slane %v1368_v3, %v140_v19 }
  0x65   : > { %288 = vmatpush1.bf16.msra.mxu0 %v1032_v24  ;;  %v960_v24 = vadd.f32 %v395_v21, %v137_v20 }
  0x66   : > { %289 = vmatprep.subr.bf16.mxu0 %v1033_v26  ;;  %911 = vmatpush3.bf16.msra.mxu1 %v1053_v31 }
  0x67   : > { %912 = vmatprep.subr.bf16.mxu1 %v1257_v10 }
  0x69   : > { %290 = vmatpush1.bf16.msra.mxu0 %v1036_v27 }
  0x6a   : > { %291 = vmatprep.subr.bf16.mxu0 %v1037_v29  ;;  %913 = vmatpush3.bf16.msra.mxu1 %v1057_v35 }
  0x6b   : > { %914 = vmatprep.subr.bf16.mxu1 %v1257_v10 }
  0x6d   : > { %292 = vmatpush1.bf16.msra.mxu0 %v1040_v30 }
  0x6e   : > { %535 = vmatprep.subr.bf16.mxu0 %v1044_v32  ;;  %915 = vmatpush3.bf16.msra.mxu1 %v1061_v39  ;;  %v144_v39 = vsub.s32 2, %v135_v17 }
  0x6f   : > { %920 = vmatprep.subr.bf16.mxu1 %v1257_v10 }
  0x70   : > { %834 = vmatmul.mubr.msk.bf16.vlgmr.msra.gmra.mrb[0].mxu0 %vm1403_vm2, %v1260_v37 }
  0x71   : > { %536 = vmatpush1.bf16.msra.mxu0 %v1042_v33  ;;  %567 = vmatprep.mubr.bf16.mxu0 %v1258_v11  ;;  %v1085_v11 = vld [vmem:[#allocation7 + $0x30] sm:$0xff]  }
  0x72   : > { %537 = vmatprep.subr.bf16.mxu0 %v1048_v36  ;;  %917 = vmatmul.mubr.msk.bf16.vlgmr.msra.gmra.mrb[0].mxu1 %vm1403_vm2, %v1260_v37 }
  0x73   : > { %921 = vmatpush3.bf16.msra.mxu1 %v1068_v42  ;;  %936 = vmatprep.mubr.msk.bf16.mxu1 %vm1259_vm0, %v1257_v10  ;;  %v145_v42 = vrot.slane %v1363_v2, %v144_v39 }
  0x74   : > { %922 = vmatprep.subr.bf16.mxu1 %v1257_v10 }
  0x75   : > { %538 = vmatpush1.bf16.msra.mxu0 %v1046_v38 }
  0x76   : > { %539 = vmatprep.subr.bf16.mxu0 %v1052_v40  ;;  %v403_v40 = vrot.slane %v1368_v3, %v144_v39 }
  0x77   : > { %923 = vmatpush3.bf16.msra.mxu1 %v1072_v45 }
  0x78   : > { %924 = vmatprep.subr.bf16.mxu1 %v1257_v10 }
  0x79   : > { %540 = vmatpush1.bf16.msra.mxu0 %v1050_v41 }
  0x7a   : > { %541 = vmatprep.subr.bf16.mxu0 %v1056_v43 }
  0x7b   : > { %925 = vmatpush3.bf16.msra.mxu1 %v1073_v48 }
  0x7c   : > { %926 = vmatprep.subr.bf16.mxu1 %v1257_v10 }
  0x7d   : > { %542 = vmatpush1.bf16.msra.mxu0 %v1054_v44 }
  0x7e   : > { %543 = vmatprep.subr.bf16.mxu0 %v1060_v46 }
  0x7f   : > { %927 = vmatpush3.bf16.msra.mxu1 %v1074_v51 }
  0x80   : > { %928 = vmatprep.subr.bf16.mxu1 %v1257_v10 }
  0x81   : > { %544 = vmatpush1.bf16.msra.mxu0 %v1058_v47 }
  0x82   : > { %545 = vmatprep.subr.bf16.mxu0 %v1064_v49 }
  0x83   : > { %929 = vmatpush3.bf16.msra.mxu1 %v1075_v54 }
  0x84   : > { %930 = vmatprep.subr.bf16.mxu1 %v1257_v10 }
  0x85   : > { %546 = vmatpush1.bf16.msra.mxu0 %v1062_v50 }
  0x86   : > { %547 = vmatprep.subr.bf16.mxu0 %v1067_v52 }
  0x87   : > { %931 = vmatpush3.bf16.msra.mxu1 %v1076_v57 }
  0x88   : > { %932 = vmatprep.subr.bf16.mxu1 %v1257_v10 }
  0x89   : > { %548 = vmatpush1.bf16.msra.mxu0 %v1065_v53 }
  0x8a   : > { %549 = vmatprep.subr.bf16.mxu0 %v1071_v55 }
  0x8b   : > { %933 = vmatpush3.bf16.msra.mxu1 %v1077_v59 }
  0x8c   : > { %934 = vmatprep.subr.bf16.mxu1 %v1257_v10 }
  0x8d   : > { %550 = vmatpush1.bf16.msra.mxu0 %v1069_v56  ;;  %v750_v56 = vld [vmem:[%s749_s3] sm:$0xff] }
  0x8e   : > { %940 = vmatprep.subr.bf16.mxu0 %v1257_v10 }
  0x8f   : > { %935 = vmatpush3.bf16.msra.mxu1 %v1078_v60 }
  0x90   : > { %568 = vmatmul.mubr.bf16.vlgmr.msra.gmra.mrb[0].mxu0 %v358_v58 }
  0x91   : > { %956 = vmatprep.mubr.msk.bf16.mxu0 %vm1259_vm0, %v1257_v10  ;;  %941 = vmatpush3.bf16.msra.mxu0 %v1079_v61 }
  0x92   : > { %937 = vmatmul.mubr.bf16.vlgmr.msra.gmra.mrb[4].mxu1 %v358_v58  ;;  %942 = vmatprep.subr.bf16.mxu0 %v1257_v10 }
  0x95   : > { %943 = vmatpush3.bf16.msra.mxu0 %v1080_v62 }
  0x96   : > { %944 = vmatprep.subr.bf16.mxu0 %v1257_v10 }
  0x99   : > { %945 = vmatpush3.bf16.msra.mxu0 %v1081_v63 }
  0x9a   : > { %946 = vmatprep.subr.bf16.mxu0 %v1257_v10 }
  0x9d   : > { %947 = vmatpush3.bf16.msra.mxu0 %v1082_v6 }
  0x9e   : > { %948 = vmatprep.subr.bf16.mxu0 %v1257_v10 }
  0xa1   : > { %949 = vmatpush3.bf16.msra.mxu0 %v1083_v8 }
  0xa2   : > { %950 = vmatprep.subr.bf16.mxu0 %v1257_v10 }
  0xa5   : > { %951 = vmatpush3.bf16.msra.mxu0 %v1084_v9 }
  0xa6   : > { %952 = vmatprep.subr.bf16.mxu0 %v1257_v10 }
  0xa9   : > { %953 = vmatpush3.bf16.msra.mxu0 %v1085_v11 }
  0xaa   : > { %954 = vmatprep.subr.bf16.mxu0 %v1257_v10  ;;  %v962_v10 = vadd.f32 %v399_v23, %v141_v22 }
  0xad   : > { %955 = vmatpush3.bf16.msra.mxu0 %v1086_v12 }
 0x145   : > { %v352_v13 = vpop.f32.mrb[0].mxu1 }
 0x146   : > { %v918_v14 = vpop.f32.mrb[1].mxu1  ;;  %v353_v46 = vadd.f32 %v352_v13, %v145_v42 }
 0x147   : > { %v355_v15 = vpop.f32.mrb[2].mxu1 }
 0x148   : > { %v919_v16 = vpop.f32.mrb[3].mxu1  ;;  %v770_v15 = vstv %s1245_s11  ;;  %s93_s11 = sadd.s32 1, %s1245_s11  }
 0x149   : > { %vm771_vm5 = vcmp.eq.s32.totalorder %v1358_v1, %v770_v15  ;;  %p90_p4 = scmp.ge.s32.totalorder %s93_s11, 8  }
 0x14a   :  { %vm773_vm6 = vcmask (%p90_p4), 64512   ;;  %s1261_s5 = smov (%p90_p4), [#allocation10]  }
 0x14b   :  { %s781_s12 = sshll.u32 (%p90_p4), %s1261_s5, 4  ;;  %s782_s12 = int_to_ptr.vmem [resolvable:$true] %s781_s12 }
 0x14c   :  { %s1185_s15 = scalar_lea.vmem (%p90_p4), %s782_s12, 128  ;;  %p1190_p6 = scmp.lt.s32.totalorder (%p90_p4), %s782_s12, %s782_s12 }
 0x14d   :  { %p1186_p5 = scmp.ne.s32.totalorder (%p90_p4), %s782_s12, %s1185_s15  ;;  %p1191_p7 = scmp.lt.s32.totalorder (%p90_p4), %s1185_s15, %s1185_s15 }
 0x14f   :  { %p1192_p8 = por (%p90_p4), %p1191_p7, %p1190_p6 }
 0x151   :  { %p1193_p9 = pnand (%p90_p4), %p1192_p8, %p1186_p5 }
 0x163   : > { %v569_v25 = vpop.f32.mrb[0].mxu0 }
 0x164   : > { %v961_v26 = vadd.f32 %v960_v24, %v569_v25  ;;  %v571_v27 = vpop.f32.mrb[1].mxu0 }
 0x165   : > { %v573_v28 = vpop.f32.mrb[2].mxu0  ;;  %v963_v31 = vadd.f32 %v962_v10, %v571_v27  ;;  %v610_v33 = vpop.f32.mrb[4].mxu1 }
 0x166   : > { %v861_v29 = vmul.f32 -1.442695, %v961_v26  ;;  %v574_v30 = vpop.f32.mrb[3].mxu0  ;;  %v938_v34 = vpop.f32.mrb[5].mxu1  ;;  %v611_v44 = vadd.f32 %v610_v33, %v403_v40 }
 0x167   : > { %v862_v32 = vmul.f32 -1.442695, %v963_v31  ;;  %v613_v35 = vpop.f32.mrb[6].mxu1 }
 0x168   : > { %1087 = vpow2.f32 %v861_v29  ;;  %v939_v36 = vpop.f32.mrb[7].mxu1 }
 0x169   : > { %1089 = vpow2.f32 %v862_v32 }
 0x172   : > { %v1088_v37 = vpop.eup %1087 }
 0x173   : > { %v620_v38 = vadd.f32 1.0, %v1088_v37  ;;  %v1090_v41 = vpop.eup %1089 }
 0x174   : > { %v627_v43 = vadd.f32 1.0, %v1090_v41 }
 0x175   : > { %1091 = vrcp.f32 %v620_v38 }
 0x176   : > { %1093 = vrcp.f32 %v627_v43 }
 0x17f   : > { %v1092_v45 = vpop.eup %1091 }
 0x180   : > { %v630_v47 = vmul.f32 %v1092_v45, %v611_v44  ;;  %v1094_v49 = vpop.eup %1093 }
 0x181   : > { %v633_v50 = vsub.f32 1.0, %v1094_v49  ;;  %v635_v53 = vmul.f32 %v1241_v7, %v1094_v49 }
 0x182   : > { %v631_v48 = vadd.f32 %v630_v47, %v353_v46 }
 0x184   : > { %1095 = vtanh.f32 %v631_v48 }
 0x18e   : > { %v1096_v51 = vpop.eup %1095 }
 0x18f   : > { %v634_v52 = vmul.f32 %v1096_v51, %v633_v50 }
 0x191   : > { %v636_v7 = vadd.f32 %v635_v53, %v634_v52  }
 0x193   : > { %v637_v54 = vpack.c.bf16 %v636_v7, %v636_v7 }
 0x195   : > { %957 = vmatmul.mubr.bf16.vlgmr.msra.gmra.mrb[4].mxu0 %v637_v54 }
 0x268   : > { %v742_v55 = vpop.f32.mrb[4].mxu0 }
 0x269   : > { %v743_v57 = vadd.f32 %v1373_v4, %v742_v55  ;;  %v958_v58 = vpop.f32.mrb[5].mxu0 }
 0x26a   : > { %v745_v59 = vpop.f32.mrb[6].mxu0 }
 0x26b   : > { %v959_v60 = vpop.f32.mrb[7].mxu0  ;;  %v751_v61 = vadd.f32 %v750_v56, %v743_v57 }
 0x26d   : > { %752 = vmax.xlane.f32.xlu0 %v751_v61 }
 0x2fa   : > { %v753_v62 = vpop.xlane.xlu0 %752 }
 0x2fb   : > { %vm754_vm3 = vcmp.eq.f32.partialorder %v751_v61, %v753_v62 }
 0x2fc   : > { %v755_v63 = vsel %vm754_vm3, %v1358_v1, 128 }
 0x2fd   : > { %v757_v6 = vshra.s32 %v755_v63, 16  ;;  %v756_v9 = vand.u32 65535, %v755_v63 }
 0x2ff   : > { %v759_v8 = vcvt.s32.f32 %v757_v6  ;;  %v758_v12 = vcvt.s32.f32 %v756_v9 }
 0x301   : > { %760 = vmin.xlane.f32.xlu0 %v759_v8 }
 0x38e   : > { %v761_v11 = vpop.xlane.xlu0 %760 }
 0x38f   : > { %vm762_vm4 = vcmp.eq.f32.partialorder %v759_v8, %v761_v11  ;;  %v767_v14 = vcvt.f32.s32 %v761_v11 }
 0x390   : > { %v763_v13 = vsel %vm762_vm4, %v758_v12, inf }
 0x391   : > { %764 = vmin.xlane.f32.xlu1 %v763_v13  ;;  %v768_v17 = vshll.u32 %v767_v14, 16 }
 0x41e   : > { %v765_v16 = vpop.xlane.xlu1 %764  ;;  %92 = sbr.rel (!%p90_p4) target bundleno = 78 (0x4e), region = 72 }
 0x41f   : > { %v766_v18 = vcvt.f32.s32 %v765_v16 }
 0x421   : > { %v769_v6 = vadd.s32 %v768_v17, %v766_v18  }
 0x423   : > { %v772_v19 = vsel %vm771_vm5, %v769_v6, %v1233_v5  }
 0x424   : > { %v1481_v5 = vmov %v772_v19  ;;  %774 = vst.msk [vmem:[#allocation10] sm:$0xff] (%p90_p4), %vm773_vm6, %v772_v19 }
 0x425   :  { %1196 = shalt.err (!%p1193_p9)
}
 0x426   :  { %s1197_s13 = scalar_lea.hbm %s1478_s7, 128 }
 0x427   :  { %p1198_p10 = scmp.ne.s32.totalorder %s1478_s7, %s1197_s13  ;;  %p1201_p11 = scmp.lt.u32.totalorder %s1197_s13, %s1478_s7 }
 0x429   :  { %p1203_p12 = pnand %p1201_p11, %p1198_p10 }
 0x42b   :  { %1206 = shalt.err (!%p1203_p12)
}
 0x42c   :  { %784 = dma.vmem_to_hbm [thread:$0]  %s782_s12, 128, %s1478_s7, [#allocation4]  }
 0x42d   :  { %1229 = dma.done.wait [#allocation4], 128  }
 0x42e   :  { %1230 = vsyncadd [#allocation4], 4294967168 }
 0x42f   :  { %788 = vsyncpa [#allocation3], 1 }
 0x430   :  { %789 = vsyncpa [#allocation6], 1 }
 0x431   :  { %790 = vsyncpa [#allocation9], 1 }
 0x432   :  { %791 = vsyncpa [#allocation4], 1 }

</bundles_post_ra>
